<compile_context>
chip_gen: v7x
topology: tpu7x:2x2x1
jax: 0.10.0
libtpu: 0.0.40
codegen_flags: <defaults>
</compile_context>

<pallas_src>
import functools

import jax
import jax.numpy as jnp
from jax import lax
from jax.experimental import pallas as pl
from jax.experimental.pallas import tpu as pltpu


def _resblock_kernel(x_ref, B1_ref, b1_ref, B2_ref, b2_ref, o_ref, *, H, WC):
    """Fused residual block for one image in lane-dense (H, W*C) layout.

    x_ref  : (1, H, WC)   input image (width-major, channel-minor on the lane dim)
    B*_ref : (3, WC, WC)  block-tridiagonal conv weights (one band matrix per kh)
    b*_ref : (1, WC)      biases, tiled across W
    o_ref  : (1, H, WC)   output
    """
    x = x_ref[0]                                         # (H, WC)
    zero_row = jnp.zeros((1, WC), jnp.float32)

    def conv3x3(a, B_ref, b_ref):
        # Output row h needs input rows h-1, h, h+1 (zero at the image boundary);
        # the W/channel mixing for each kh is one matmul against the banded weight.
        a_up = jnp.concatenate([zero_row, a[:H - 1, :]], axis=0)   # a_up[h] = a[h-1]
        a_dn = jnp.concatenate([a[1:, :], zero_row], axis=0)       # a_dn[h] = a[h+1]
        acc = jnp.broadcast_to(b_ref[...].astype(jnp.float32), (H, WC))
        acc = acc + jnp.dot(a_up, B_ref[0], preferred_element_type=jnp.float32)
        acc = acc + jnp.dot(a,    B_ref[1], preferred_element_type=jnp.float32)
        acc = acc + jnp.dot(a_dn, B_ref[2], preferred_element_type=jnp.float32)
        return acc

    a0 = jnp.maximum(x.astype(jnp.float32), 0.0)
    r1 = conv3x3(a0, B1_ref, b1_ref)
    # TODO(synk): dropout_probability > 0 path (nn.Dropout) not implemented; module default is 0.
    a1 = jnp.maximum(r1, 0.0)
    r2 = conv3x3(a1, B2_ref, b2_ref)

    o_ref[0] = (x.astype(jnp.float32) + r2).astype(o_ref.dtype)


def _band_weights(w_oihw, W):
    """OIHW (C,C,3,3) 3x3 'same' conv weights -> (3, W*C, W*C) banded matmul weights.

    B[kh][(wo+kw-1)*C + ci, wo*C + co] = w[co, ci, kh, kw]  (out-of-range kw dropped,
    which implements the zero padding along W).
    """
    w_hwio = jnp.transpose(w_oihw, (2, 3, 1, 0)).astype(jnp.float32)   # (3, 3, Cin, Cout)
    bands = []
    for kh in range(3):
        blocks = []
        for kw in range(3):
            d = kw - 1
            shift = jnp.eye(W, k=-d, dtype=jnp.float32)                # ones at [wo + d, wo]
            blocks.append(jnp.kron(shift, w_hwio[kh, kw]))
        bands.append(blocks[0] + blocks[1] + blocks[2])
    return jnp.stack(bands, axis=0)


def residual_block_pallas(x_nchw, w1_oihw, b1, w2_oihw, b2):
    """ResidualBlock forward (resample=None). x_nchw: (N, C, H, W); weights: (C, C, 3, 3)."""
    N, C, H, W = x_nchw.shape
    WC = W * C

    # One-time layout glue in plain JAX (no jnp.pad of the activations).
    x_rows = jnp.transpose(x_nchw, (0, 2, 3, 1)).reshape(N, H, WC)
    B1 = _band_weights(w1_oihw, W)
    B2 = _band_weights(w2_oihw, W)
    b1r = jnp.tile(b1.astype(jnp.float32), W).reshape(1, WC)
    b2r = jnp.tile(b2.astype(jnp.float32), W).reshape(1, WC)

    kernel = functools.partial(_resblock_kernel, H=H, WC=WC)

    out_rows = pl.pallas_call(
        kernel,
        out_shape=jax.ShapeDtypeStruct((N, H, WC), x_nchw.dtype),
        grid_spec=pltpu.PrefetchScalarGridSpec(
            num_scalar_prefetch=0,
            grid=(N,),
            in_specs=[
                pl.BlockSpec((1, H, WC), lambda n: (n, 0, 0)),
                pl.BlockSpec((3, WC, WC), lambda n: (0, 0, 0)),
                pl.BlockSpec((1, WC), lambda n: (0, 0)),
                pl.BlockSpec((3, WC, WC), lambda n: (0, 0, 0)),
                pl.BlockSpec((1, WC), lambda n: (0, 0)),
            ],
            out_specs=pl.BlockSpec((1, H, WC), lambda n: (n, 0, 0)),
        ),
        compiler_params=pltpu.CompilerParams(dimension_semantics=("parallel",)),
    )(x_rows, B1, b1r, B2, b2r)

    out_nhwc = out_rows.reshape(N, H, W, C)
    return jnp.transpose(out_nhwc, (0, 3, 1, 2))   # back to NCHW


def _reference_forward(x, w1, b1, w2, b2):
    """Plain-JAX reference matching the PyTorch module semantics (NCHW/OIHW)."""
    dn = lax.conv_dimension_numbers(x.shape, w1.shape, ('NCHW', 'OIHW', 'NCHW'))
    r1 = lax.conv_general_dilated(jnp.maximum(x, 0.0), w1, (1, 1),
                                  ((1, 1), (1, 1)), dimension_numbers=dn,
                                  precision=lax.Precision.HIGHEST)
    r1 = r1 + b1[None, :, None, None]
    r2 = lax.conv_general_dilated(jnp.maximum(r1, 0.0), w2, (1, 1),
                                  ((1, 1), (1, 1)), dimension_numbers=dn,
                                  precision=lax.Precision.HIGHEST)
    r2 = r2 + b2[None, :, None, None]
    return x + r2


if __name__ == "__main__":
    N, C, H, W = 2, 4, 16, 16
    key = jax.random.PRNGKey(0)
    kx, k1, kb1, k2, kb2 = jax.random.split(key, 5)

    # deterministic synthetic parameters (PyTorch-like uniform init bounds)
    fan_in = C * 3 * 3
    bound = 1.0 / (fan_in ** 0.5)
    x = jax.random.normal(kx, (N, C, H, W), jnp.float32)
    w1 = jax.random.uniform(k1, (C, C, 3, 3), jnp.float32, -bound, bound)
    b1 = jax.random.uniform(kb1, (C,), jnp.float32, -bound, bound)
    w2 = jax.random.uniform(k2, (C, C, 3, 3), jnp.float32, -bound, bound)
    b2 = jax.random.uniform(kb2, (C,), jnp.float32, -bound, bound)

    out = residual_block_pallas(x, w1, b1, w2, b2)
    out = jax.block_until_ready(out)

    ref = jax.block_until_ready(_reference_forward(x, w1, b1, w2, b2))
    assert out.shape == (N, C, H, W)
    assert jnp.allclose(out, ref, atol=1e-3, rtol=1e-3), "mismatch vs reference"

    print("KERNEL_OK")
</pallas_src>

<mosaic_0001>
module attributes {stable_mosaic.version = 11 : i64} {
  func.func @_resblock_kernel(%arg0: i32, %arg1: memref<1x16x64xf32, #tpu.memory_space<vmem>>, %arg2: memref<3x64x64xf32, #tpu.memory_space<vmem>>, %arg3: memref<1x64xf32, #tpu.memory_space<vmem>>, %arg4: memref<3x64x64xf32, #tpu.memory_space<vmem>>, %arg5: memref<1x64xf32, #tpu.memory_space<vmem>>, %arg6: memref<1x16x64xf32, #tpu.memory_space<vmem>>) attributes {dimension_semantics = [#tpu.dimension_semantics<parallel>], iteration_bounds = array<i64: 2>, scalar_prefetch = 0 : i64, scratch_operands = 0 : i64, tpu.core_type = #tpu.core_type<tc>, window_params = [{transform_indices = @transform_0, window_bounds = array<i64: 1, 16, 64>}, {pipeline_mode = #tpu.pipeline_mode<synchronous>, transform_indices = @transform_1, window_bounds = array<i64: 3, 64, 64>}, {pipeline_mode = #tpu.pipeline_mode<synchronous>, transform_indices = @transform_2, window_bounds = array<i64: 1, 64>}, {pipeline_mode = #tpu.pipeline_mode<synchronous>, transform_indices = @transform_3, window_bounds = array<i64: 3, 64, 64>}, {pipeline_mode = #tpu.pipeline_mode<synchronous>, transform_indices = @transform_4, window_bounds = array<i64: 1, 64>}, {transform_indices = @transform_5, window_bounds = array<i64: 1, 16, 64>}]} {
    %c0 = arith.constant 0 : index
    %c0_0 = arith.constant 0 : index
    %c0_1 = arith.constant 0 : index
    %0 = vector.load %arg1[%c0, %c0_0, %c0_1] : memref<1x16x64xf32, #tpu.memory_space<vmem>>, vector<1x16x64xf32>
    %1 = vector.shape_cast %0 : vector<1x16x64xf32> to vector<16x64xf32>
    %cst = arith.constant 0.000000e+00 : f32
    %2 = vector.broadcast %cst : f32 to vector<1x64xf32>
    %cst_2 = arith.constant 0.000000e+00 : f32
    %3 = vector.broadcast %cst_2 : f32 to vector<16x64xf32>
    %4 = arith.maximumf %1, %3 : vector<16x64xf32>
    %5 = vector.extract_strided_slice %4 {offsets = [0, 0], sizes = [15, 64], strides = [1, 1]} : vector<16x64xf32> to vector<15x64xf32>
    %6 = tpu.concatenate %2, %5 in 0 : vector<1x64xf32>, vector<15x64xf32> -> vector<16x64xf32>
    %7 = vector.extract_strided_slice %4 {offsets = [1, 0], sizes = [15, 64], strides = [1, 1]} : vector<16x64xf32> to vector<15x64xf32>
    %8 = tpu.concatenate %7, %2 in 0 : vector<15x64xf32>, vector<1x64xf32> -> vector<16x64xf32>
    %c0_3 = arith.constant 0 : index
    %c0_4 = arith.constant 0 : index
    %9 = vector.load %arg3[%c0_3, %c0_4] : memref<1x64xf32, #tpu.memory_space<vmem>>, vector<1x64xf32>
    %10 = vector.shape_cast %9 : vector<1x64xf32> to vector<1x64xf32>
    %11 = vector.broadcast %10 : vector<1x64xf32> to vector<16x64xf32>
    %c0_5 = arith.constant 0 : index
    %c0_6 = arith.constant 0 : index
    %c0_7 = arith.constant 0 : index
    %12 = vector.load %arg2[%c0_5, %c0_6, %c0_7] : memref<3x64x64xf32, #tpu.memory_space<vmem>>, vector<1x64x64xf32>
    %13 = vector.shape_cast %12 : vector<1x64x64xf32> to vector<64x64xf32>
    %cst_8 = arith.constant dense<0.000000e+00> : vector<16x64xf32>
    %14 = tpu.matmul %6, %13, %cst_8 {dimension_numbers = #tpu.dot_dimension_numbers<[1], [0], [0], [1], [0, 0, 1, 1], [], []>} : vector<16x64xf32>, vector<64x64xf32>, vector<16x64xf32> -> vector<16x64xf32>
    %15 = arith.addf %11, %14 : vector<16x64xf32>
    %c1 = arith.constant 1 : index
    %c0_9 = arith.constant 0 : index
    %c0_10 = arith.constant 0 : index
    %16 = vector.load %arg2[%c1, %c0_9, %c0_10] : memref<3x64x64xf32, #tpu.memory_space<vmem>>, vector<1x64x64xf32>
    %17 = vector.shape_cast %16 : vector<1x64x64xf32> to vector<64x64xf32>
    %cst_11 = arith.constant dense<0.000000e+00> : vector<16x64xf32>
    %18 = tpu.matmul %4, %17, %cst_11 {dimension_numbers = #tpu.dot_dimension_numbers<[1], [0], [0], [1], [0, 0, 1, 1], [], []>} : vector<16x64xf32>, vector<64x64xf32>, vector<16x64xf32> -> vector<16x64xf32>
    %19 = arith.addf %15, %18 : vector<16x64xf32>
    %c2 = arith.constant 2 : index
    %c0_12 = arith.constant 0 : index
    %c0_13 = arith.constant 0 : index
    %20 = vector.load %arg2[%c2, %c0_12, %c0_13] : memref<3x64x64xf32, #tpu.memory_space<vmem>>, vector<1x64x64xf32>
    %21 = vector.shape_cast %20 : vector<1x64x64xf32> to vector<64x64xf32>
    %cst_14 = arith.constant dense<0.000000e+00> : vector<16x64xf32>
    %22 = tpu.matmul %8, %21, %cst_14 {dimension_numbers = #tpu.dot_dimension_numbers<[1], [0], [0], [1], [0, 0, 1, 1], [], []>} : vector<16x64xf32>, vector<64x64xf32>, vector<16x64xf32> -> vector<16x64xf32>
    %23 = arith.addf %19, %22 : vector<16x64xf32>
    %cst_15 = arith.constant 0.000000e+00 : f32
    %24 = vector.broadcast %cst_15 : f32 to vector<16x64xf32>
    %25 = arith.maximumf %23, %24 : vector<16x64xf32>
    %26 = vector.extract_strided_slice %25 {offsets = [0, 0], sizes = [15, 64], strides = [1, 1]} : vector<16x64xf32> to vector<15x64xf32>
    %27 = tpu.concatenate %2, %26 in 0 : vector<1x64xf32>, vector<15x64xf32> -> vector<16x64xf32>
    %28 = vector.extract_strided_slice %25 {offsets = [1, 0], sizes = [15, 64], strides = [1, 1]} : vector<16x64xf32> to vector<15x64xf32>
    %29 = tpu.concatenate %28, %2 in 0 : vector<15x64xf32>, vector<1x64xf32> -> vector<16x64xf32>
    %c0_16 = arith.constant 0 : index
    %c0_17 = arith.constant 0 : index
    %30 = vector.load %arg5[%c0_16, %c0_17] : memref<1x64xf32, #tpu.memory_space<vmem>>, vector<1x64xf32>
    %31 = vector.shape_cast %30 : vector<1x64xf32> to vector<1x64xf32>
    %32 = vector.broadcast %31 : vector<1x64xf32> to vector<16x64xf32>
    %c0_18 = arith.constant 0 : index
    %c0_19 = arith.constant 0 : index
    %c0_20 = arith.constant 0 : index
    %33 = vector.load %arg4[%c0_18, %c0_19, %c0_20] : memref<3x64x64xf32, #tpu.memory_space<vmem>>, vector<1x64x64xf32>
    %34 = vector.shape_cast %33 : vector<1x64x64xf32> to vector<64x64xf32>
    %cst_21 = arith.constant dense<0.000000e+00> : vector<16x64xf32>
    %35 = tpu.matmul %27, %34, %cst_21 {dimension_numbers = #tpu.dot_dimension_numbers<[1], [0], [0], [1], [0, 0, 1, 1], [], []>} : vector<16x64xf32>, vector<64x64xf32>, vector<16x64xf32> -> vector<16x64xf32>
    %36 = arith.addf %32, %35 : vector<16x64xf32>
    %c1_22 = arith.constant 1 : index
    %c0_23 = arith.constant 0 : index
    %c0_24 = arith.constant 0 : index
    %37 = vector.load %arg4[%c1_22, %c0_23, %c0_24] : memref<3x64x64xf32, #tpu.memory_space<vmem>>, vector<1x64x64xf32>
    %38 = vector.shape_cast %37 : vector<1x64x64xf32> to vector<64x64xf32>
    %cst_25 = arith.constant dense<0.000000e+00> : vector<16x64xf32>
    %39 = tpu.matmul %25, %38, %cst_25 {dimension_numbers = #tpu.dot_dimension_numbers<[1], [0], [0], [1], [0, 0, 1, 1], [], []>} : vector<16x64xf32>, vector<64x64xf32>, vector<16x64xf32> -> vector<16x64xf32>
    %40 = arith.addf %36, %39 : vector<16x64xf32>
    %c2_26 = arith.constant 2 : index
    %c0_27 = arith.constant 0 : index
    %c0_28 = arith.constant 0 : index
    %41 = vector.load %arg4[%c2_26, %c0_27, %c0_28] : memref<3x64x64xf32, #tpu.memory_space<vmem>>, vector<1x64x64xf32>
    %42 = vector.shape_cast %41 : vector<1x64x64xf32> to vector<64x64xf32>
    %cst_29 = arith.constant dense<0.000000e+00> : vector<16x64xf32>
    %43 = tpu.matmul %29, %42, %cst_29 {dimension_numbers = #tpu.dot_dimension_numbers<[1], [0], [0], [1], [0, 0, 1, 1], [], []>} : vector<16x64xf32>, vector<64x64xf32>, vector<16x64xf32> -> vector<16x64xf32>
    %44 = arith.addf %40, %43 : vector<16x64xf32>
    %45 = arith.addf %1, %44 : vector<16x64xf32>
    %c0_30 = arith.constant 0 : index
    %c0_31 = arith.constant 0 : index
    %c0_32 = arith.constant 0 : index
    %46 = vector.load %arg6[%c0_30, %c0_31, %c0_32] : memref<1x16x64xf32, #tpu.memory_space<vmem>>, vector<1x16x64xf32>
    %47 = vector.shape_cast %46 : vector<1x16x64xf32> to vector<16x64xf32>
    %48 = vector.shape_cast %45 : vector<16x64xf32> to vector<1x16x64xf32>
    tpu.vector_store %arg6[%c0_30, %c0_31, %c0_32], %48 {strides = array<i32>} : memref<1x16x64xf32, #tpu.memory_space<vmem>>, vector<1x16x64xf32>,
    return
  }
  func.func @transform_0(%arg0: i32) -> (i32, i32, i32) {
    %c0_i32 = arith.constant 0 : i32
    %c0_i32_0 = arith.constant 0 : i32
    %c0_i32_1 = arith.constant 0 : i32
    return %arg0, %c0_i32, %c0_i32_0 : i32, i32, i32
  }
  func.func @transform_1(%arg0: i32) -> (i32, i32, i32) {
    %c0_i32 = arith.constant 0 : i32
    %c0_i32_0 = arith.constant 0 : i32
    %c0_i32_1 = arith.constant 0 : i32
    %c0_i32_2 = arith.constant 0 : i32
    return %c0_i32, %c0_i32_0, %c0_i32_1 : i32, i32, i32
  }
  func.func @transform_2(%arg0: i32) -> (i32, i32) {
    %c0_i32 = arith.constant 0 : i32
    %c0_i32_0 = arith.constant 0 : i32
    %c0_i32_1 = arith.constant 0 : i32
    return %c0_i32, %c0_i32_0 : i32, i32
  }
  func.func @transform_3(%arg0: i32) -> (i32, i32, i32) {
    %c0_i32 = arith.constant 0 : i32
    %c0_i32_0 = arith.constant 0 : i32
    %c0_i32_1 = arith.constant 0 : i32
    %c0_i32_2 = arith.constant 0 : i32
    return %c0_i32, %c0_i32_0, %c0_i32_1 : i32, i32, i32
  }
  func.func @transform_4(%arg0: i32) -> (i32, i32) {
    %c0_i32 = arith.constant 0 : i32
    %c0_i32_0 = arith.constant 0 : i32
    %c0_i32_1 = arith.constant 0 : i32
    return %c0_i32, %c0_i32_0 : i32, i32
  }
  func.func @transform_5(%arg0: i32) -> (i32, i32, i32) {
    %c0_i32 = arith.constant 0 : i32
    %c0_i32_0 = arith.constant 0 : i32
    %c0_i32_1 = arith.constant 0 : i32
    return %arg0, %c0_i32, %c0_i32_0 : i32, i32, i32
  }
}

</mosaic_0001>

<bundles_post_ra>
// kernel: tpu_custom_call.1
= control target key start
LH: loop header
LB: loop body
LE: loop exit
PB: predicated region body
PF: predicated region fallthrough
CT: control target
= control target key end

     0   :  { %10 = vsyncpa [#allocation3], 0  ;;  %s1847_s0 = inlined_call_operand.hbm [shape: f32[2,16,64], index: 0, kind: input, shape index: {}]   ;;  %s1848_s1 = inlined_call_operand.hbm [shape: f32[3,64,64], index: 1, kind: input, shape index: {}]   ;;  %s1849_s2 = inlined_call_operand.vmem [shape: f32[1,64], index: 2, kind: input, shape index: {}]   ;;  %s1850_s3 = inlined_call_operand.hbm [shape: f32[3,64,64], index: 3, kind: input, shape index: {}]   ;;  %s1851_s4 = inlined_call_operand.vmem [shape: f32[1,64], index: 4, kind: input, shape index: {}]   ;;  %s1852_s5 = inlined_call_operand.hbm [shape: f32[2,16,64], index: 5, kind: output, shape index: {}]  }
   0x1   :  { %12 = vsyncpa [#allocation3 + $0x1], 0 }
   0x2   :  { %13 = vsyncpa [#allocation6], 0 }
   0x3   :  { %14 = vsyncpa [#allocation4], 0 }
   0x4   :  { %16 = vsyncpa [#allocation4 + $0x1], 0  ;;  %s1554_s18 = smov 0   ;;  %s1556_s19 = smov 0  }
   0x5   :  { %s1558_s20 = smov 0   ;;  %s1560_s21 = smov 0  }
   0x6 LB: > { %s1575_s22 = sadd.s32 4294967295, %s1514_s21   ;;  %s971_s23 = sadd.s32 4294967294, %s1514_s21   ;;  %s1514_s21 = sphi %s1560_s21, %s1872_s21   ;;  %s1510_s20 = sphi %s1558_s20, %s1871_s20   ;;  %s1506_s19 = sphi %s1556_s19, %s1870_s19   ;;  %s1502_s18 = sphi %s1554_s18, %s1869_s18  }
   0x7   : > { %p42_p0 = scmp.ne.s32.totalorder %s1506_s19, %s1502_s18  ;;  %p1853_p1 = scmp.eq.s32.totalorder %s1575_s22, 0 }
   0x8   : > { %p156_p3 = scmp.eq.s32.totalorder %s971_s23, 1  ;;  %p972_p5 = scmp.ge.s32.totalorder %s1514_s21, 1 }
   0x9   : > { %p1584_p4 = por %p1853_p1, %p42_p0  ;;  %p163_p7 = scmp.lt.s32.totalorder %s1514_s21, 3 }
   0xa   : > { %p1589_p6 = por %p156_p3, %p42_p0  ;;  %s1516_s27 = smov [#allocation5]  }
   0xb   : > { %s1856_s24 = scalar_select %p1584_p4, 1, 0 }
   0xc   : > { %s1857_s25 = scalar_select %p1589_p6, 1, 0 }
   0xd   : > { %p1594_p8 = pnand %p972_p5, %p163_p7  ;;  %s175_s28 = sshll.u32 %s1516_s27, 4  ;;  %s1598_s28 = int_to_ptr.vmem [resolvable:$true] %s175_s28 }
   0xe   : > { %s1517_s30 = smov [#allocation7]   ;;  %s1358_s9 = scalar_lea.hbm %s1848_s1, 3072 }
   0xf   : > { %p1299_p9 = pneg %p1594_p8  ;;  %s191_s6 = sshll.u32 %s1517_s30, 4  ;;  %s1609_s6 = int_to_ptr.vmem [resolvable:$true] %s191_s6 }
  0x10   : > { %p1359_p12 = scmp.ne.s32.totalorder %s1848_s1, %s1358_s9  ;;  %p1365_p5 = scmp.lt.u32.totalorder %s1358_s9, %s1848_s1 }
  0x11   : > { %p1605_p11 = pnand %p1299_p9, %p1853_p1 }
  0x13   : > { %p1360_p13 = pneg %p1605_p11 }
  0x15   : > { %p1361_p0 = pnand %p1360_p13, %p1359_p12 }
  0x17   : > { %p1362_p3 = pneg %p1361_p0 }
  0x19   : > { %p1367_p7 = pnand %p1365_p5, %p1362_p3 }
  0x1b   : > { %1370 = shalt.err (!%p1367_p7)
}
  0x1c   : > { %s1371_s14 = scalar_lea.vmem %s1598_s28, 3072  ;;  %p1379_p2 = scmp.lt.s32.totalorder %s1598_s28, %s1598_s28 }
  0x1d   : > { %p1372_p9 = scmp.ne.s32.totalorder %s1598_s28, %s1371_s14  ;;  %p1380_p12 = scmp.lt.s32.totalorder %s1371_s14, %s1371_s14 }
  0x1f   : > { %p1374_p10 = pnand %p1372_p9, %p1360_p13  ;;  %p1381_p0 = por %p1380_p12, %p1379_p2 }
  0x21   : > { %p1375_p1 = pneg %p1374_p10 }
  0x23   : > { %p1382_p6 = pnand %p1381_p0, %p1375_p1 }
  0x25   : > { %1385 = shalt.err (!%p1382_p6)
}
  0x26   : > { %s1518_s15 = smov 128   ;;  %s1519_s16 = smov 8  }
  0x27   : > { %1302 = dma.hbm_to_vmem [thread:$0]  (!%p1605_p11), %s1848_s1, 3072, %s1598_s28, [#allocation6], %s1518_s15, %s1518_s15, %s1519_s16  }
  0x28   : > { %s1386_s7 = scalar_lea.hbm %s1850_s3, 3072 }
  0x29   : > { %p1387_p1 = scmp.ne.s32.totalorder %s1850_s3, %s1386_s7  ;;  %p1393_p10 = scmp.lt.u32.totalorder %s1386_s7, %s1850_s3 }
  0x2b   : > { %p1389_p2 = pnand %p1387_p1, %p1360_p13 }
  0x2d   : > { %p1390_p6 = pneg %p1389_p2 }
  0x2f   : > { %p1395_p3 = pnand %p1393_p10, %p1390_p6 }
  0x31   : > { %1398 = shalt.err (!%p1395_p3)
}
  0x32   : > { %s1399_s28 = scalar_lea.vmem %s1609_s6, 3072  ;;  %p1407_p12 = scmp.lt.s32.totalorder %s1609_s6, %s1609_s6 }
  0x33   : > { %p1400_p5 = scmp.ne.s32.totalorder %s1609_s6, %s1399_s28  ;;  %p1408_p0 = scmp.lt.s32.totalorder %s1399_s28, %s1399_s28 }
  0x35   : > { %p1402_p7 = pnand %p1400_p5, %p1360_p13  ;;  %p1409_p1 = por %p1408_p0, %p1407_p12 }
  0x37   : > { %p1403_p9 = pneg %p1402_p7 }
  0x39   : > { %p1410_p2 = pnand %p1409_p1, %p1403_p9 }
  0x3b   : > { %1413 = shalt.err (!%p1410_p2)
}
  0x3c   : > { %1305 = dma.hbm_to_vmem [thread:$0]  (!%p1605_p11), %s1850_s3, 3072, %s1609_s6, [#allocation6], %s1518_s15, %s1518_s15, %s1519_s16  }
  0x3d   : > { %s1670_s29 = sadd.s32 1, %s1514_s21   ;;  %s29_s14 = sadd.s32 1, %s1510_s20 }
  0x3e   : > { %s26_s17 = ssub.s32 %s1514_s21, %s1670_s29  ;;  %p36_p13 = scmp.ne.s32.totalorder %s1510_s20, %s1506_s19 }
  0x3f   : > { %p27_p6 = scmp.eq.s32.totalorder %s26_s17, 0  ;;  %p37_p10 = scmp.eq.s32.totalorder %s1514_s21, 0 }
  0x40   : > { %p1860_p3 = scmp.eq.s32.totalorder %s1575_s22, 1  ;;  %p1316_p7 = scmp.lt.s32.totalorder %s1514_s21, 2 }
  0x41   : > { %s1686_s27 = scalar_select %p27_p6, %s1510_s20, %s29_s14  }
  0x42   : > { %p1680_p5 = por %p1860_p3, %p36_p13  ;;  %p38_p9 = por %p37_p10, %p36_p13 }
  0x43   : > { %s208_s30 = sand.u32 1, %s1510_s20   ;;  %s1003_s6 = sshll.u32 %s1514_s21, 8 }
  0x44   : > { %s1861_s23 = scalar_select %p1680_p5, 1, 0 }
  0x45   : > { %s976_s7 = sshll.u32 %s208_s30, 4  ;;  %s1693_s10 = scalar_lea.hbm %s1847_s0, %s1003_s6 }
  0x46   : > { %s212_s11 = scalar_lea.vmem [#allocation2], %s976_s7  ;;  %p1697_p11 = pnand %p1316_p7, %p38_p9 }
  0x47   : > { %s219_s28 = sshll.u32 %s212_s11, 4  ;;  %s1701_s13 = scalar_lea.sflag [#allocation3], %s208_s30  ;;  %s1695_s28 = int_to_ptr.vmem [resolvable:$true] %s219_s28 }
  0x48   : > { %s1414_s14 = scalar_lea.hbm %s1693_s10, 256  ;;  %p1416_p0 = pneg %p1697_p11 }
  0x49   : > { %p1415_p12 = scmp.ne.s32.totalorder %s1693_s10, %s1414_s14  ;;  %s1419_s6 = scalar_lea.hbm %s1847_s0, 512 }
  0x4a   : > { %p1420_p13 = scmp.lt.u32.totalorder %s1693_s10, %s1847_s0  ;;  %p1421_p6 = scmp.lt.u32.totalorder %s1419_s6, %s1414_s14 }
  0x4b   : > { %p1417_p1 = pnand %p1416_p0, %p1415_p12  ;;  %p1423_p3 = scmp.lt.u32.totalorder %s1414_s14, %s1693_s10 }
  0x4c   : > { %p1422_p10 = por %p1421_p6, %p1420_p13 }
  0x4d   : > { %p1418_p2 = pneg %p1417_p1 }
  0x4e   : > { %p1424_p7 = por %p1423_p3, %p1422_p10 }
  0x50   : > { %p1425_p9 = pnand %p1424_p7, %p1418_p2 }
  0x52   : > { %1428 = shalt.err (!%p1425_p9)
}
  0x53   : > { %s1429_s30 = scalar_lea.vmem %s1695_s28, 256  ;;  %s1520_s11 = smov [#allocation2]  }
  0x54   : > { %p1430_p12 = scmp.ne.s32.totalorder %s1695_s28, %s1429_s30  ;;  %s1434_s17 = sshll.u32 %s1520_s11, 4  ;;  %s1435_s17 = int_to_ptr.vmem [resolvable:$false] %s1434_s17 }
  0x55   : > { %s1436_s7 = scalar_lea.vmem %s1435_s17, 512  ;;  %p1437_p4 = scmp.lt.s32.totalorder %s1695_s28, %s1435_s17 }
  0x56   : > { %p1432_p1 = pnand %p1430_p12, %p1416_p0  ;;  %p1438_p13 = scmp.lt.s32.totalorder %s1436_s7, %s1429_s30 }
  0x58   : > { %p1433_p5 = pneg %p1432_p1  ;;  %p1439_p6 = por %p1438_p13, %p1437_p4 }
  0x5a   : > { %p1440_p10 = pnand %p1439_p6, %p1433_p5 }
  0x5c   : > { %1443 = shalt.err (!%p1440_p10)
}
  0x5d   : > { %1309 = dma.hbm_to_vmem [thread:$0]  (!%p1697_p11), %s1693_s10, 256, %s1695_s28, %s1701_s13, %s1518_s15, %s1518_s15, %s1519_s16  }
  0x5e   : > { %231 = sbr.rel (%p1594_p8) target bundleno = 641 (0x281), region = 40  ;;  %s1735_s14 = sand.u32 (!%p1594_p8), 1, %s1506_s19  }
  0x5f   : > { %s980_s6 = sshll.u32 (!%p1594_p8), %s1735_s14, 4  ;;  %s234_s8 = scalar_lea.sflag (!%p1594_p8), [#allocation3], %s1735_s14 }
  0x60   : > { %s237_s12 = scalar_lea.vmem (!%p1594_p8), [#allocation2], %s980_s6  ;;  %p1863_p4 = scmp.ne.s32.totalorder (!%p1594_p8), %s1856_s24, 0 }
  0x65   : > { %1489 = dma.done.wait (%p1863_p4), %s234_s8, 256  }
  0x66   : > { %1491 = vsyncadd (%p1863_p4), %s234_s8, 4294967040  ;;  %p1864_p5 = scmp.eq.s32.totalorder %s1575_s22, 0 }
  0x68   : > { %1493 = dma.done.wait (%p1864_p5), [#allocation6], 6144   ;;  %p1865_p8 = pmov %p1864_p5 }
  0x69   : > { %v297_v0 = vld [vmem:[#allocation5] sm:$0xff]  ;;  %v298_v1 = vld [vmem:[#allocation5 + $0x8] sm:$0xff]  ;;  %v299_v2 = vld [vmem:[#allocation5 + $0x10] sm:$0xff]  ;;  %vm278_vm0 = vcmask 1040384   ;;  %vm305_vm1 = vcmask 523264   ;;  %vm284_vm2 = vcmask 1046528  }
  0x6a   : > { %1495 = vsyncadd (%p1865_p8), [#allocation6], 4294961152  ;;  %v1179_v3 = vpack.c.bf16 %v298_v1, %v297_v0  ;;  %v300_v4 = vld [vmem:[#allocation5 + $0x18] sm:$0xff]  ;;  %v301_v6 = vld [vmem:[#allocation5 + $0x20] sm:$0xff]  ;;  %s1004_s10 = sshll.u32 %s1575_s22, 8  ;;  %s271_s28 = scalar_lea.vmem [#allocation8], %s980_s6 }
  0x6b   : > { %v1183_v5 = vpack.c.bf16 %v300_v4, %v299_v2  ;;  %v302_v7 = vld [vmem:[#allocation5 + $0x28] sm:$0xff]  ;;  %v1749_v8 = vld [vmem:[%s237_s12] sm:$0xff]  ;;  %v304_v14 = vld [vmem:[#allocation5 + $0x38] sm:$0xff]  ;;  %s879_s13 = sshll.u32 %s271_s28, 4  ;;  %s1798_s11 = scalar_lea.hbm %s1852_s5, %s1004_s10  ;;  %s1800_s13 = int_to_ptr.vmem [resolvable:$true] %s879_s13 }
  0x6c   : > { %1180 = vmatprep.subr.bf16.mxu0 %v1179_v3  ;;  %v1752_v9 = vmax.f32 %v1749_v8, 0.0  ;;  %v1187_v10 = vpack.c.bf16 %v302_v7, %v301_v6  ;;  %v1755_v12 = vld [vmem:[%s237_s12 + $0x8] sm:$0xff]  ;;  %v303_v13 = vld [vmem:[#allocation5 + $0x30] sm:$0xff]  ;;  %v590_v17 = vld [vmem:[#allocation7] sm:$0xff]  ;;  %s866_s22 = scalar_lea.sflag [#allocation4], %s1735_s14  ;;  %s1444_s17 = scalar_lea.vmem %s1800_s13, 256 }
  0x6d   : > { %1182 = vmatpush3.bf16.msra.mxu0 %v1179_v3  ;;  %v1760_v16 = vmax.f32 %v1755_v12, 0.0  ;;  %v1191_v18 = vpack.c.bf16 %v304_v14, %v303_v13  ;;  %v591_v19 = vld [vmem:[#allocation7 + $0x8] sm:$0xff]  ;;  %v592_v20 = vld [vmem:[#allocation7 + $0x10] sm:$0xff]  ;;  %v593_v21 = vld [vmem:[#allocation7 + $0x18] sm:$0xff]  ;;  %p1445_p11 = scmp.ne.s32.totalorder %s1800_s13, %s1444_s17  ;;  %p1866_p0 = scmp.ne.s32.totalorder %s1861_s23, 0 }
  0x6e   : > { %1184 = vmatprep.subr.bf16.mxu0 %v1183_v5  ;;  %v279_v11 = vrot.slane %v1752_v9, 7  ;;  %v389_v22 = vld [vmem:[#allocation5 + $0x40] sm:$0xff]  ;;  %v390_v23 = vld [vmem:[#allocation5 + $0x48] sm:$0xff]  ;;  %v1227_v24 = vpack.c.bf16 %v591_v19, %v590_v17  ;;  %v1231_v25 = vpack.c.bf16 %v593_v21, %v592_v20  ;;  %v391_v28 = vld [vmem:[#allocation5 + $0x50] sm:$0xff]  ;;  %v285_v41 = vrot.slane %v1752_v9, 1  ;;  %s1521_s7 = smov [#allocation8]  }
  0x6f   : > { %v280_v26 = vrot.slane %v1760_v16, 7  ;;  %v1195_v27 = vpack.c.bf16 %v390_v23, %v389_v22  ;;  %v392_v29 = vld [vmem:[#allocation5 + $0x58] sm:$0xff]  ;;  %v393_v32 = vld [vmem:[#allocation5 + $0x60] sm:$0xff]  ;;  %v394_v33 = vld [vmem:[#allocation5 + $0x68] sm:$0xff]  ;;  %v286_v42 = vrot.slane %v1760_v16, 1  ;;  %p1446_p2 = pnand %p1445_p11, %p1866_p0  ;;  %s1448_s6 = sshll.u32 %s1521_s7, 4  ;;  %s1449_s6 = int_to_ptr.vmem [resolvable:$false] %s1448_s6 }
  0x70   : > { %v283_v15 = vsel %vm278_vm0, 0.0, %v279_v11  ;;  %1228 = vmatprep.subr.bf16.mxu1 %v1227_v24  ;;  %v1199_v31 = vpack.c.bf16 %v392_v29, %v391_v28  ;;  %v1203_v34 = vpack.c.bf16 %v394_v33, %v393_v32  ;;  %v395_v35 = vld [vmem:[#allocation5 + $0x70] sm:$0xff]  ;;  %v396_v36 = vld [vmem:[#allocation5 + $0x78] sm:$0xff]  ;;  %v479_v38 = vld [vmem:[#allocation5 + $0x80] sm:$0xff]  ;;  %s1450_s8 = scalar_lea.vmem %s1449_s6, 512  ;;  %p1451_p7 = scmp.lt.s32.totalorder %s1800_s13, %s1449_s6 }
  0x71   : > { %1186 = vmatpush3.bf16.msra.mxu0 %v1183_v5  ;;  %1081 = vmatprep.mubr.msk.f32.mxu0 %vm305_vm1, %v283_v15  ;;  %v281_v30 = vsel %vm278_vm0, %v279_v11, %v280_v26  ;;  %v1207_v37 = vpack.c.bf16 %v396_v36, %v395_v35  ;;  %v480_v39 = vld [vmem:[#allocation5 + $0x88] sm:$0xff]  ;;  %v481_v43 = vld [vmem:[#allocation5 + $0x90] sm:$0xff]  ;;  %v482_v44 = vld [vmem:[#allocation5 + $0x98] sm:$0xff]  ;;  %v287_v46 = vsel %vm284_vm2, %v285_v41, %v286_v42  ;;  %v289_v53 = vsel %vm284_vm2, %v286_v42, 0.0  ;;  %p1447_p3 = pneg %p1446_p2  ;;  %p1452_p9 = scmp.lt.s32.totalorder %s1450_s8, %s1444_s17 }
  0x72   : > { %1188 = vmatprep.subr.bf16.mxu0 %v1187_v10  ;;  %1230 = vmatpush3.bf16.msra.mxu1 %v1227_v24  ;;  %v1211_v40 = vpack.c.bf16 %v480_v39, %v479_v38  ;;  %v1215_v45 = vpack.c.bf16 %v482_v44, %v481_v43  ;;  %v483_v47 = vld [vmem:[#allocation5 + $0xa0] sm:$0xff]  ;;  %v484_v48 = vld [vmem:[#allocation5 + $0xa8] sm:$0xff]  ;;  %v485_v50 = vld [vmem:[#allocation5 + $0xb0] sm:$0xff] }
  0x73   : > { %1232 = vmatprep.subr.bf16.mxu1 %v1231_v25  ;;  %v1219_v49 = vpack.c.bf16 %v484_v48, %v483_v47  ;;  %v486_v51 = vld [vmem:[#allocation5 + $0xb8] sm:$0xff]  ;;  %v594_v54 = vld [vmem:[#allocation7 + $0x20] sm:$0xff]  ;;  %v595_v55 = vld [vmem:[#allocation7 + $0x28] sm:$0xff]  ;;  %p1453_p12 = por %p1452_p9, %p1451_p7 }
  0x74   : > { %v1223_v52 = vpack.c.bf16 %v486_v51, %v485_v50  ;;  %v1235_v56 = vpack.c.bf16 %v595_v55, %v594_v54  ;;  %v596_v57 = vld [vmem:[#allocation7 + $0x30] sm:$0xff]  ;;  %v597_v58 = vld [vmem:[#allocation7 + $0x38] sm:$0xff]  ;;  %v681_v60 = vld [vmem:[#allocation7 + $0x40] sm:$0xff] }
  0x75   : > { %1190 = vmatpush3.bf16.msra.mxu0 %v1187_v10  ;;  %v1239_v59 = vpack.c.bf16 %v597_v58, %v596_v57  ;;  %v682_v61 = vld [vmem:[#allocation7 + $0x48] sm:$0xff]  ;;  %v984_v63 = vld [vmem:[%s1849_s2] ss:$0 sm:$0xff]  ;;  %v684_v10 = vld [vmem:[#allocation7 + $0x58] sm:$0xff]  ;;  %p1454_p1 = pnand %p1453_p12, %p1447_p3 }
  0x76   : > { %1192 = vmatprep.subr.bf16.mxu0 %v1191_v18  ;;  %1234 = vmatpush3.bf16.msra.mxu1 %v1231_v25  ;;  %v1243_v62 = vpack.c.bf16 %v682_v61, %v681_v60  ;;  %v686_v19 = vld [vmem:[#allocation7 + $0x68] sm:$0xff]  ;;  %v687_v21 = vld [vmem:[#allocation7 + $0x70] sm:$0xff]  ;;  %v688_v22 = vld [vmem:[#allocation7 + $0x78] sm:$0xff] }
  0x77   : > { %1236 = vmatprep.subr.bf16.mxu1 %v1235_v56  ;;  %v1255_v23 = vpack.c.bf16 %v688_v22, %v687_v21  ;;  %v771_v24 = vld [vmem:[#allocation7 + $0x80] sm:$0xff]  ;;  %v772_v25 = vld [vmem:[#allocation7 + $0x88] sm:$0xff]  ;;  %v774_v28 = vld [vmem:[#allocation7 + $0x98] sm:$0xff] }
  0x78   : > { %v1259_v26 = vpack.c.bf16 %v772_v25, %v771_v24  ;;  %v777_v33 = vld [vmem:[#allocation7 + $0xb0] sm:$0xff] }
  0x79   : > { %1194 = vmatpush3.bf16.msra.mxu0 %v1191_v18  ;;  %v685_v18 = vld [vmem:[#allocation7 + $0x60] sm:$0xff] }
  0x7a   : > { %1196 = vmatprep.subr.bf16.mxu0 %v1195_v27  ;;  %1238 = vmatpush3.bf16.msra.mxu1 %v1235_v56  ;;  %v1251_v20 = vpack.c.bf16 %v686_v19, %v685_v18 }
  0x7b   : > { %1240 = vmatprep.subr.bf16.mxu1 %v1239_v59 }
  0x7c   : > { %1082 = vmatmul.mubr.msk.f32.vlgmr.msra.gmra.mrb[0].mxu0 %vm305_vm1, %v281_v30  ;;  %v775_v30 = vld [vmem:[#allocation7 + $0xa0] sm:$0xff] }
  0x7d   : > { %1198 = vmatpush3.bf16.msra.mxu0 %v1195_v27  ;;  %1100 = vmatprep.mubr.msk.f32.mxu0 %vm305_vm1, %v1752_v9  ;;  %v683_v9 = vld [vmem:[#allocation7 + $0x50] sm:$0xff] }
  0x7e   : > { %1200 = vmatprep.subr.bf16.mxu0 %v1199_v31  ;;  %1242 = vmatpush3.bf16.msra.mxu1 %v1239_v59  ;;  %v773_v27 = vld [vmem:[#allocation7 + $0x90] sm:$0xff] }
  0x7f   : > { %1244 = vmatprep.subr.bf16.mxu1 %v1243_v62  ;;  %v1263_v29 = vpack.c.bf16 %v774_v28, %v773_v27 }
  0x81   : > { %1202 = vmatpush3.bf16.msra.mxu0 %v1199_v31  ;;  %v776_v31 = vld [vmem:[#allocation7 + $0xa8] sm:$0xff] }
  0x82   : > { %1204 = vmatprep.subr.bf16.mxu0 %v1203_v34  ;;  %v1267_v32 = vpack.c.bf16 %v776_v31, %v775_v30 }
  0x85   : > { %1206 = vmatpush3.bf16.msra.mxu0 %v1203_v34  ;;  %v778_v34 = vld [vmem:[#allocation7 + $0xb8] sm:$0xff] }
  0x86   : > { %1208 = vmatprep.subr.bf16.mxu0 %v1207_v37  ;;  %v1271_v35 = vpack.c.bf16 %v778_v34, %v777_v33 }
  0x89   : > { %1210 = vmatpush3.bf16.msra.mxu0 %v1207_v37  ;;  %v991_v37 = vld [vmem:[%s1851_s4] ss:$0 sm:$0xff] }
  0x8a   : > { %1212 = vmatprep.subr.bf16.mxu0 %v1211_v40 }
  0x8c   : > { %1101 = vmatmul.mubr.msk.f32.vlgmr.msra.gmra.mrb[0].mxu0 %vm305_vm1, %v1760_v16  ;;  %v1247_v16 = vpack.c.bf16 %v684_v10, %v683_v9 }
  0x8d   : > { %1214 = vmatpush3.bf16.msra.mxu0 %v1211_v40  ;;  %1119 = vmatprep.mubr.msk.f32.mxu0 %vm305_vm1, %v287_v46 }
  0x8e   : > { %1216 = vmatprep.subr.bf16.mxu0 %v1215_v45 }
  0x91   : > { %1218 = vmatpush3.bf16.msra.mxu0 %v1215_v45 }
  0x92   : > { %1220 = vmatprep.subr.bf16.mxu0 %v1219_v49 }
  0x95   : > { %1222 = vmatpush3.bf16.msra.mxu0 %v1219_v49 }
  0x96   : > { %1224 = vmatprep.subr.bf16.mxu0 %v1223_v52 }
  0x99   : > { %1226 = vmatpush3.bf16.msra.mxu0 %v1223_v52 }
  0x9c   : > { %1120 = vmatmul.mubr.msk.f32.vlgmr.msra.gmra.mrb[0].mxu0 %vm305_vm1, %v289_v53 }
 0x16f   : > { %v1121_v0 = vpop.f32.mrb[0].mxu0 }
 0x170   : > { %v1275_v1 = vadd.f32 %v1121_v0, %v984_v63  ;;  %v558_v2 = vpop.f32.mrb[1].mxu0 }
 0x171   : > { %v1276_v3 = vadd.f32 %v984_v63, %v558_v2 }
 0x172   : > { %v570_v4 = vmax.f32 %v1275_v1, 0.0 }
 0x173   : > { %v569_v5 = vmax.f32 %v1276_v3, 0.0 }
 0x174   : > { %v574_v6 = vrot.slane %v570_v4, 7  ;;  %v579_v7 = vrot.slane %v570_v4, 1 }
 0x175   : > { %v578_v11 = vrot.slane %v569_v5, 1  ;;  %v573_v13 = vrot.slane %v569_v5, 7 }
 0x176   : > { %v582_v36 = vsel %vm284_vm2, %v579_v7, 0.0 }
 0x177   : > { %v577_v14 = vsel %vm278_vm0, 0.0, %v573_v13  ;;  %v575_v15 = vsel %vm278_vm0, %v573_v13, %v574_v6  ;;  %v580_v17 = vsel %vm284_vm2, %v578_v11, %v579_v7 }
 0x178   : > { %1138 = vmatprep.mubr.msk.f32.mxu1 %vm305_vm1, %v577_v14 }
 0x179   : > { %1139 = vmatmul.mubr.msk.f32.vlgmr.msra.gmra.mrb[0].mxu1 %vm305_vm1, %v575_v15 }
 0x17a   : > { %1246 = vmatpush3.bf16.msra.mxu1 %v1243_v62  ;;  %1157 = vmatprep.mubr.msk.f32.mxu1 %vm305_vm1, %v569_v5 }
 0x17b   : > { %1248 = vmatprep.subr.bf16.mxu1 %v1247_v16 }
 0x17e   : > { %1250 = vmatpush3.bf16.msra.mxu1 %v1247_v16 }
 0x17f   : > { %1252 = vmatprep.subr.bf16.mxu1 %v1251_v20 }
 0x182   : > { %1254 = vmatpush3.bf16.msra.mxu1 %v1251_v20 }
 0x183   : > { %1256 = vmatprep.subr.bf16.mxu1 %v1255_v23 }
 0x186   : > { %1258 = vmatpush3.bf16.msra.mxu1 %v1255_v23 }
 0x187   : > { %1260 = vmatprep.subr.bf16.mxu1 %v1259_v26 }
 0x189   : > { %1158 = vmatmul.mubr.msk.f32.vlgmr.msra.gmra.mrb[0].mxu1 %vm305_vm1, %v570_v4 }
 0x18a   : > { %1262 = vmatpush3.bf16.msra.mxu1 %v1259_v26  ;;  %1176 = vmatprep.mubr.msk.f32.mxu1 %vm305_vm1, %v580_v17 }
 0x18b   : > { %1264 = vmatprep.subr.bf16.mxu1 %v1263_v29 }
 0x18e   : > { %1266 = vmatpush3.bf16.msra.mxu1 %v1263_v29 }
 0x18f   : > { %1268 = vmatprep.subr.bf16.mxu1 %v1267_v32 }
 0x192   : > { %1270 = vmatpush3.bf16.msra.mxu1 %v1267_v32 }
 0x193   : > { %1272 = vmatprep.subr.bf16.mxu1 %v1271_v35 }
 0x196   : > { %1274 = vmatpush3.bf16.msra.mxu1 %v1271_v35 }
 0x199   : > { %1177 = vmatmul.mubr.msk.f32.vlgmr.msra.gmra.mrb[0].mxu1 %vm305_vm1, %v582_v36 }
 0x26c   : > { %v1178_v38 = vpop.f32.mrb[0].mxu1 }
 0x26d   : > { %v1277_v39 = vadd.f32 %v1178_v38, %v991_v37  ;;  %v850_v40 = vpop.f32.mrb[1].mxu1 }
 0x26e   : > { %v1278_v41 = vadd.f32 %v991_v37, %v850_v40 }
 0x26f   : > { %v862_v42 = vadd.f32 %v1277_v39, %v1755_v12 }
 0x270   : > { %v861_v43 = vadd.f32 %v1278_v41, %v1749_v8 }
 0x271   : > { %864 = vst.msk [vmem:[%s271_s28 + $0x8] sm:$0xff] %vm305_vm1, %v862_v42 }
 0x272   : > { %863 = vst.msk [vmem:[%s271_s28] sm:$0xff] %vm305_vm1, %v861_v43 }
 0x273   : > { %1457 = shalt.err (!%p1454_p1)
}
 0x274   : > { %s1458_s12 = scalar_lea.hbm %s1798_s11, 256  ;;  %s1462_s15 = scalar_lea.hbm %s1852_s5, 512 }
 0x275   : > { %p1459_p13 = scmp.ne.s32.totalorder %s1798_s11, %s1458_s12  ;;  %p1463_p4 = scmp.lt.u32.totalorder %s1798_s11, %s1852_s5 }
 0x276   : > { %p1464_p5 = scmp.lt.u32.totalorder %s1462_s15, %s1458_s12  ;;  %p1466_p11 = scmp.lt.u32.totalorder %s1458_s12, %s1798_s11 }
 0x277   : > { %p1460_p6 = pnand %p1459_p13, %p1866_p0 }
 0x278   : > { %p1465_p8 = por %p1464_p5, %p1463_p4 }
 0x279   : > { %p1461_p10 = pneg %p1460_p6 }
 0x27a   : > { %p1467_p2 = por %p1466_p11, %p1465_p8 }
 0x27c   : > { %p1468_p3 = pnand %p1467_p2, %p1461_p10 }
 0x27e   : > { %1471 = shalt.err (!%p1468_p3)
}
 0x27f   : > { %s1522_s28 = smov 128   ;;  %s1523_s9 = smov 8  }
 0x280   : > { %1297 = dma.vmem_to_hbm [thread:$0]  (%p1866_p0), %s1800_s13, 256, %s1798_s11, %s866_s22, %s1522_s28, %s1522_s28, %s1523_s9  }
 0x281 PF: > { %s894_s30 = sand.u32 1, %s1502_s18   ;;  %p1867_p7 = scmp.ne.s32.totalorder %s1857_s25, 0 }
 0x282   : > { %p1868_p9 = scmp.ge.s32.totalorder %s1514_s21, 2  ;;  %s895_s17 = scalar_lea.sflag [#allocation4], %s894_s30 }
 0x284   : > { %p1311_p12 = pnand %p1868_p9, %p1867_p7 }
 0x286   : > { %1497 = dma.done.wait (!%p1311_p12), %s895_s17, 256  }
 0x287   : > { %1499 = vsyncadd (!%p1311_p12), %s895_s17, 4294967040  ;;  %p19_p1 = scmp.ge.s32.totalorder %s1670_s29, 4   ;;  %s1869_s18 = smov %s1506_s19 }
 0x288   : > { %s1870_s19 = smov %s1510_s20  ;;  %s1871_s20 = smov %s1686_s27 }
 0x289   : > { %s1872_s21 = smov %s1670_s29  ;;  %21 = sbr.rel (!%p19_p1) target bundleno = 6 (0x6), region = 97 }
 0x290   :  { %900 = vsyncpa [#allocation3], 1 }
 0x291   :  { %902 = vsyncpa [#allocation3 + $0x1], 1 }
 0x292   :  { %903 = vsyncpa [#allocation6], 1 }
 0x293   :  { %904 = vsyncpa [#allocation4], 1 }
 0x294   :  { %906 = vsyncpa [#allocation4 + $0x1], 1 }

</bundles_post_ra>
